<compile_context>
chip_gen: v7x
topology: tpu7x:2x2x1
jax: 0.10.0
libtpu: 0.0.40
codegen_flags: <defaults>
</compile_context>

<pallas_src>
import functools

import jax
import jax.numpy as jnp
from jax import lax
from jax.experimental import pallas as pl
from jax.experimental.pallas import tpu as pltpu


_VMEM_LIMIT_BYTES = 48 * 1024 * 1024   # raised scoped VMEM; safe on v5e/v6e/v7x
_IO_VMEM_BUDGET = 28 * 1024 * 1024     # budget used for row-tile sizing


def _round_up(x, m):
    return ((x + m - 1) // m) * m


def _pick_tile_rows(n, dim, dtype_bytes):
    """Largest row tile that fits the VMEM budget (kernel is mem-bound)."""
    # Per-row VMEM: 2 inputs + 1 output, double-buffered (6 slabs) in the io
    # dtype, plus ~5 f32 temporaries (x1, x2, diff, mix, centered) in the body.
    per_row = dim * (6 * dtype_bytes + 5 * 4)
    sub = 8 if dtype_bytes >= 4 else 16          # sublane packing granularity
    tile = max(sub, (_IO_VMEM_BUDGET // per_row) // sub * sub)
    tile = min(tile, 2048)                       # diminishing returns past ~2K rows
    # Never make the block taller than the (sublane-rounded) row count.
    tile = min(tile, max(sub, _round_up(n, sub)))
    # Keep >= ~4 grid steps when n permits (v7x megacore: 2 TCs share the grid).
    if n > 4 * sub:
        tile = min(tile, _round_up(pl.cdiv(n, 4), sub))
    return tile


def _gate_mix(x1_ref, x2_ref, p_ref):
    """gate = sigmoid(concat(x1,x2,x1-x2) @ W); return x1*gate + x2*(1-gate).

    p_ref rows: [0] = w1 + w3, [1] = w2 - w3 (folded gate weights).
    Mix is computed as x2 + gate*(x1 - x2), which is algebraically identical.
    """
    x1 = x1_ref[...].astype(jnp.float32)                      # (tile, dim)
    x2 = x2_ref[...].astype(jnp.float32)                      # (tile, dim)
    wa = p_ref[0:1, :].astype(jnp.float32)                    # (1, dim)
    wb = p_ref[1:2, :].astype(jnp.float32)                    # (1, dim)
    # concat(x1, x2, x1-x2) @ W == sum(x1*(w1+w3) + x2*(w2-w3)) over lanes.
    logits = jnp.sum(x1 * wa + x2 * wb, axis=-1, keepdims=True)   # (tile, 1)
    gate = jax.nn.sigmoid(logits)                              # EUP
    return x2 + gate * (x1 - x2)                               # f32 (tile, dim)


def _gate_only_kernel(x1_ref, x2_ref, p_ref, o_ref):
    o_ref[...] = _gate_mix(x1_ref, x2_ref, p_ref).astype(o_ref.dtype)


def _gated_residual_ln_kernel(x1_ref, x2_ref, p_ref, o_ref, *, eps):
    y = _gate_mix(x1_ref, x2_ref, p_ref)
    # LayerNorm over the last dim (torch default eps=1e-5).
    mean = jnp.mean(y, axis=-1, keepdims=True)
    centered = y - mean
    var = jnp.mean(centered * centered, axis=-1, keepdims=True)
    r = lax.rsqrt(var + eps)                                   # (tile, 1), EUP
    gamma = p_ref[2:3, :].astype(jnp.float32)                  # (1, dim)
    beta = p_ref[3:4, :].astype(jnp.float32)                   # (1, dim)
    o_ref[...] = (centered * r * gamma + beta).astype(o_ref.dtype)


def gated_residual(x1, x2, w, gamma=None, beta=None, *, only_gate=False,
                   eps=1e-5, tile_rows=None):
    """x1, x2: [..., dim]; w: (3*dim,); gamma, beta: (dim,) (unused if only_gate)."""
    assert x1.shape == x2.shape
    dim = x1.shape[-1]
    assert w.shape == (3 * dim,)

    orig_shape = x1.shape
    x1f = x1.reshape(-1, dim)
    x2f = x2.reshape(-1, dim)
    n = x1f.shape[0]

    dtype_bytes = jnp.dtype(x1.dtype).itemsize
    if tile_rows is None:
        tile_rows = _pick_tile_rows(n, dim, dtype_bytes)
    grid = (pl.cdiv(n, tile_rows),)               # ragged last block is fine

    # Fold the three-chunk gate projection into two per-lane weight rows and
    # pack all constant per-lane parameters into one slab.
    w3d = w.astype(jnp.float32).reshape(3, dim)
    wa = w3d[0] + w3d[2]
    wb = w3d[1] - w3d[2]

    row_spec = pl.BlockSpec((tile_rows, dim), lambda i: (i, 0))

    if only_gate:
        params = jnp.stack([wa, wb], axis=0)                          # (2, dim)
        kernel = _gate_only_kernel
    else:
        assert gamma is not None and beta is not None
        params = jnp.stack([wa, wb,
                            gamma.astype(jnp.float32),
                            beta.astype(jnp.float32)], axis=0)        # (4, dim)
        kernel = functools.partial(_gated_residual_ln_kernel, eps=eps)

    p_rows = params.shape[0]
    p_spec = pl.BlockSpec((p_rows, dim), lambda i: (0, 0))

    out = pl.pallas_call(
        kernel,
        out_shape=jax.ShapeDtypeStruct((n, dim), x1.dtype),
        grid_spec=pltpu.PrefetchScalarGridSpec(
            num_scalar_prefetch=0,
            grid=grid,
            in_specs=[row_spec, row_spec, p_spec],
            out_specs=row_spec,
        ),
        compiler_params=pltpu.CompilerParams(
            dimension_semantics=("parallel",),
            vmem_limit_bytes=_VMEM_LIMIT_BYTES),
    )(x1f, x2f, params)

    return out.reshape(orig_shape)


def gated_residual_reference(x1, x2, w, gamma, beta, *, only_gate=False,
                             eps=1e-5):
    gate_input = jnp.concatenate([x1, x2, x1 - x2], axis=-1)
    gate = jax.nn.sigmoid(gate_input @ w.reshape(-1, 1))
    y = x1 * gate + x2 * (1.0 - gate)
    if only_gate:
        return y
    mean = jnp.mean(y, axis=-1, keepdims=True)
    var = jnp.mean((y - mean) ** 2, axis=-1, keepdims=True)
    return (y - mean) * lax.rsqrt(var + eps) * gamma + beta


if __name__ == "__main__":
    key = jax.random.PRNGKey(0)
    k1, k2, k3, k4, k5 = jax.random.split(key, 5)

    batch, seq, dim = 2, 8, 32          # small shapes consistent with the module
    x1 = jax.random.normal(k1, (batch, seq, dim), dtype=jnp.float32)
    x2 = jax.random.normal(k2, (batch, seq, dim), dtype=jnp.float32)

    # Deterministic synthetic parameters (shapes from nn.Linear(dim*3, 1) and
    # nn.LayerNorm(dim)).
    w = jax.random.normal(k3, (3 * dim,), dtype=jnp.float32) * (1.0 / (3 * dim) ** 0.5)
    gamma = jnp.ones((dim,), dtype=jnp.float32)
    beta = jnp.zeros((dim,), dtype=jnp.float32)

    # Full path (LayerNorm).
    out = gated_residual(x1, x2, w, gamma, beta, only_gate=False)
    out = jax.block_until_ready(out)
    ref = gated_residual_reference(x1, x2, w, gamma, beta, only_gate=False)
    assert out.shape == x1.shape
    assert jnp.allclose(out, ref, atol=1e-4, rtol=1e-4), "mismatch vs reference (LN path)"

    # only_gate path (no gamma/beta in the param slab).
    out_g = gated_residual(x1, x2, w, only_gate=True)
    out_g = jax.block_until_ready(out_g)
    ref_g = gated_residual_reference(x1, x2, w, gamma, beta, only_gate=True)
    assert jnp.allclose(out_g, ref_g, atol=1e-4, rtol=1e-4), "mismatch vs reference (gate path)"

    # Ragged last-block path (n = 15 rows, explicit 8-row tiles -> grid of 2,
    # second block only partially valid).
    x1r = jax.random.normal(k4, (3, 5, dim), dtype=jnp.float32)
    x2r = jax.random.normal(k5, (3, 5, dim), dtype=jnp.float32)
    out_r = gated_residual(x1r, x2r, w, gamma, beta, only_gate=False, tile_rows=8)
    out_r = jax.block_until_ready(out_r)
    ref_r = gated_residual_reference(x1r, x2r, w, gamma, beta, only_gate=False)
    assert jnp.allclose(out_r, ref_r, atol=1e-4, rtol=1e-4), "mismatch vs reference (ragged path)"

    print("KERNEL_OK")
</pallas_src>

<mosaic_0001>
module attributes {stable_mosaic.version = 11 : i64} {
  func.func @_gated_residual_ln_kernel(%arg0: i32, %arg1: memref<16x32xf32, #tpu.memory_space<vmem>>, %arg2: memref<16x32xf32, #tpu.memory_space<vmem>>, %arg3: memref<4x32xf32, #tpu.memory_space<vmem>>, %arg4: memref<16x32xf32, #tpu.memory_space<vmem>>) attributes {dimension_semantics = [#tpu.dimension_semantics<parallel>], iteration_bounds = array<i64: 1>, scalar_prefetch = 0 : i64, scratch_operands = 0 : i64, tpu.core_type = #tpu.core_type<tc>, window_params = [{transform_indices = @transform_0, window_bounds = array<i64: 16, 32>}, {transform_indices = @transform_1, window_bounds = array<i64: 16, 32>}, {pipeline_mode = #tpu.pipeline_mode<synchronous>, transform_indices = @transform_2, window_bounds = array<i64: 4, 32>}, {transform_indices = @transform_3, window_bounds = array<i64: 16, 32>}]} {
    %c0 = arith.constant 0 : index
    %c0_0 = arith.constant 0 : index
    %0 = vector.load %arg1[%c0, %c0_0] : memref<16x32xf32, #tpu.memory_space<vmem>>, vector<16x32xf32>
    %c0_1 = arith.constant 0 : index
    %c0_2 = arith.constant 0 : index
    %1 = vector.load %arg2[%c0_1, %c0_2] : memref<16x32xf32, #tpu.memory_space<vmem>>, vector<16x32xf32>
    %c0_3 = arith.constant 0 : index
    %c0_4 = arith.constant 0 : index
    %2 = vector.load %arg3[%c0_3, %c0_4] : memref<4x32xf32, #tpu.memory_space<vmem>>, vector<1x32xf32>
    %c1 = arith.constant 1 : index
    %c0_5 = arith.constant 0 : index
    %3 = vector.load %arg3[%c1, %c0_5] : memref<4x32xf32, #tpu.memory_space<vmem>>, vector<1x32xf32>
    %4 = vector.broadcast %2 : vector<1x32xf32> to vector<16x32xf32>
    %5 = arith.mulf %0, %4 : vector<16x32xf32>
    %6 = vector.broadcast %3 : vector<1x32xf32> to vector<16x32xf32>
    %7 = arith.mulf %1, %6 : vector<16x32xf32>
    %8 = arith.addf %5, %7 : vector<16x32xf32>
    %cst = arith.constant dense<0.000000e+00> : vector<16xf32>
    %9 = vector.multi_reduction <add>, %8, %cst [1] : vector<16x32xf32> to vector<16xf32>
    %10 = vector.shape_cast %9 : vector<16xf32> to vector<16x1xf32>
    %11 = arith.negf %10 : vector<16x1xf32>
    %12 = math.exp %11 : vector<16x1xf32>
    %cst_6 = arith.constant 1.000000e+00 : f32
    %13 = vector.broadcast %cst_6 : f32 to vector<16x1xf32>
    %14 = arith.addf %13, %12 : vector<16x1xf32>
    %15 = arith.divf %13, %14 : vector<16x1xf32>
    %16 = arith.subf %0, %1 : vector<16x32xf32>
    %17 = vector.broadcast %15 : vector<16x1xf32> to vector<16x32xf32>
    %18 = arith.mulf %17, %16 : vector<16x32xf32>
    %19 = arith.addf %1, %18 : vector<16x32xf32>
    %cst_7 = arith.constant dense<0.000000e+00> : vector<16xf32>
    %20 = vector.multi_reduction <add>, %19, %cst_7 [1] : vector<16x32xf32> to vector<16xf32>
    %21 = vector.shape_cast %20 : vector<16xf32> to vector<16x1xf32>
    %cst_8 = arith.constant 3.200000e+01 : f32
    %22 = vector.broadcast %cst_8 : f32 to vector<16x1xf32>
    %23 = arith.divf %21, %22 : vector<16x1xf32>
    %24 = vector.broadcast %23 : vector<16x1xf32> to vector<16x32xf32>
    %25 = arith.subf %19, %24 : vector<16x32xf32>
    %26 = arith.mulf %25, %25 : vector<16x32xf32>
    %cst_9 = arith.constant dense<0.000000e+00> : vector<16xf32>
    %27 = vector.multi_reduction <add>, %26, %cst_9 [1] : vector<16x32xf32> to vector<16xf32>
    %28 = vector.shape_cast %27 : vector<16xf32> to vector<16x1xf32>
    %cst_10 = arith.constant 3.200000e+01 : f32
    %29 = vector.broadcast %cst_10 : f32 to vector<16x1xf32>
    %30 = arith.divf %28, %29 : vector<16x1xf32>
    %cst_11 = arith.constant 9.99999974E-6 : f32
    %31 = vector.broadcast %cst_11 : f32 to vector<16x1xf32>
    %32 = arith.addf %30, %31 : vector<16x1xf32>
    %33 = math.rsqrt %32 : vector<16x1xf32>
    %c2 = arith.constant 2 : index
    %c0_12 = arith.constant 0 : index
    %34 = vector.load %arg3[%c2, %c0_12] : memref<4x32xf32, #tpu.memory_space<vmem>>, vector<1x32xf32>
    %c3 = arith.constant 3 : index
    %c0_13 = arith.constant 0 : index
    %35 = vector.load %arg3[%c3, %c0_13] : memref<4x32xf32, #tpu.memory_space<vmem>>, vector<1x32xf32>
    %36 = vector.broadcast %33 : vector<16x1xf32> to vector<16x32xf32>
    %37 = arith.mulf %25, %36 : vector<16x32xf32>
    %38 = vector.broadcast %34 : vector<1x32xf32> to vector<16x32xf32>
    %39 = arith.mulf %37, %38 : vector<16x32xf32>
    %40 = vector.broadcast %35 : vector<1x32xf32> to vector<16x32xf32>
    %41 = arith.addf %39, %40 : vector<16x32xf32>
    %c0_14 = arith.constant 0 : index
    %c0_15 = arith.constant 0 : index
    %42 = vector.load %arg4[%c0_14, %c0_15] : memref<16x32xf32, #tpu.memory_space<vmem>>, vector<16x32xf32>
    tpu.vector_store %arg4[%c0_14, %c0_15], %41 {strides = array<i32>} : memref<16x32xf32, #tpu.memory_space<vmem>>, vector<16x32xf32>,
    return
  }
  func.func @transform_0(%arg0: i32) -> (i32, i32) {
    %c0_i32 = arith.constant 0 : i32
    %c0_i32_0 = arith.constant 0 : i32
    return %arg0, %c0_i32 : i32, i32
  }
  func.func @transform_1(%arg0: i32) -> (i32, i32) {
    %c0_i32 = arith.constant 0 : i32
    %c0_i32_0 = arith.constant 0 : i32
    return %arg0, %c0_i32 : i32, i32
  }
  func.func @transform_2(%arg0: i32) -> (i32, i32) {
    %c0_i32 = arith.constant 0 : i32
    %c0_i32_0 = arith.constant 0 : i32
    %c0_i32_1 = arith.constant 0 : i32
    return %c0_i32, %c0_i32_0 : i32, i32
  }
  func.func @transform_3(%arg0: i32) -> (i32, i32) {
    %c0_i32 = arith.constant 0 : i32
    %c0_i32_0 = arith.constant 0 : i32
    return %arg0, %c0_i32 : i32, i32
  }
}

</mosaic_0001>

<bundles_post_ra>
// kernel: tpu_custom_call.1
= control target key start
LH: loop header
LB: loop body
LE: loop exit
PB: predicated region body
PF: predicated region fallthrough
CT: control target
= control target key end

     0   :  { %8 = vsyncpa [#allocation3], 0  ;;  %s334_s0 = inlined_call_operand.hbm [shape: f32[16,32], index: 0, kind: input, shape index: {}]   ;;  %s335_s1 = inlined_call_operand.hbm [shape: f32[16,32], index: 1, kind: input, shape index: {}]   ;;  %s336_s2 = inlined_call_operand.vmem [shape: f32[4,32], index: 2, kind: input, shape index: {}]   ;;  %s337_s3 = inlined_call_operand.hbm [shape: f32[16,32], index: 3, kind: output, shape index: {}]  }
   0x1   :  { %9 = vsyncpa [#allocation6], 0 }
   0x2   :  { %10 = vsyncpa [#allocation4], 0  ;;  %s244_s12 = smov [#allocation2]   ;;  %s172_s16 = scalar_lea.hbm %s334_s0, 256 }
   0x3   :  { %s16_s13 = sshll.u32 %s244_s12, 4  ;;  %p173_p0 = scmp.ne.s32.totalorder %s334_s0, %s172_s16  ;;  %s17_s13 = int_to_ptr.vmem [resolvable:$true] %s16_s13 }
   0x4   :  { %p176_p1 = scmp.lt.u32.totalorder %s172_s16, %s334_s0 }
   0x6   :  { %p178_p2 = pnand %p176_p1, %p173_p0 }
   0x8   :  { %181 = shalt.err (!%p178_p2)
}
   0x9   :  { %s182_s21 = scalar_lea.vmem %s17_s13, 256  ;;  %p187_p4 = scmp.lt.s32.totalorder %s17_s13, %s17_s13 }
   0xa   :  { %p183_p3 = scmp.ne.s32.totalorder %s17_s13, %s182_s21  ;;  %p188_p5 = scmp.lt.s32.totalorder %s182_s21, %s182_s21 }
   0xc   :  { %p189_p6 = por %p188_p5, %p187_p4 }
   0xe   :  { %p190_p7 = pnand %p189_p6, %p183_p3 }
  0x10   :  { %193 = shalt.err (!%p190_p7)
}
  0x11   :  { %s245_s22 = smov 128   ;;  %s246_s23 = smov 8  }
  0x12   :  { %22 = dma.hbm_to_vmem [thread:$0]  %s334_s0, 256, %s17_s13, [#allocation3], %s245_s22, %s245_s22, %s246_s23  }
  0x13   :  { %s247_s26 = smov [#allocation5]   ;;  %s194_s30 = scalar_lea.hbm %s335_s1, 256 }
  0x14   :  { %s28_s27 = sshll.u32 %s247_s26, 4  ;;  %p195_p8 = scmp.ne.s32.totalorder %s335_s1, %s194_s30  ;;  %s29_s27 = int_to_ptr.vmem [resolvable:$true] %s28_s27 }
  0x15   :  { %p198_p9 = scmp.lt.u32.totalorder %s194_s30, %s335_s1 }
  0x17   :  { %p200_p10 = pnand %p198_p9, %p195_p8 }
  0x19   :  { %203 = shalt.err (!%p200_p10)
}
  0x1a   :  { %s204_s8 = scalar_lea.vmem %s29_s27, 256  ;;  %p209_p12 = scmp.lt.s32.totalorder %s29_s27, %s29_s27 }
  0x1b   :  { %p205_p11 = scmp.ne.s32.totalorder %s29_s27, %s204_s8  ;;  %p210_p13 = scmp.lt.s32.totalorder %s204_s8, %s204_s8 }
  0x1d   :  { %p211_p0 = por %p210_p13, %p209_p12 }
  0x1f   :  { %p212_p1 = pnand %p211_p0, %p205_p11 }
  0x21   :  { %215 = shalt.err (!%p212_p1)
}
  0x22   :  { %34 = dma.hbm_to_vmem [thread:$0]  %s335_s1, 256, %s29_s27, [#allocation6], %s245_s22, %s245_s22, %s246_s23  }
  0x23   :  { %238 = dma.done.wait [#allocation3], 256  }
  0x24   :  { %239 = vsyncadd [#allocation3], 4294967040 }
  0x25   :  { %240 = dma.done.wait [#allocation6], 256  }
  0x26   :  { %241 = vsyncadd [#allocation6], 4294967040  ;;  %v43_v0 = vld [vmem:[#allocation2] sm:$0xff]  ;;  %v45_v1 = vld [vmem:[#allocation5] sm:$0xff]  ;;  %vm63_vm0 = vcmask 261120   ;;  %s248_s17 = smov [#allocation7]  }
  0x27   :  { %v149_v2 = vld [vmem:[%s336_s2] ss:$0 sm:$0xff]  ;;  %v150_v3 = vld [vmem:[%s336_s2 + $0x1] ss:$0 sm:$0xff]  ;;  %v44_v5 = vld [vmem:[#allocation2 + $0x8] sm:$0xff]  ;;  %v82_v22 = vsub.f32 %v43_v0, %v45_v1  ;;  %s136_s18 = sshll.u32 %s248_s17, 4  ;;  %s137_s18 = int_to_ptr.vmem [resolvable:$true] %s136_s18 }
  0x28   :  { %v53_v4 = vmul.f32 %v149_v2, %v43_v0  ;;  %v46_v6 = vld [vmem:[#allocation5 + $0x8] sm:$0xff]  ;;  %v59_v7 = vmul.f32 %v150_v3, %v45_v1  ;;  %v54_v8 = vmul.f32 %v149_v2, %v44_v5  ;;  %v153_v49 = vld [vmem:[%s336_s2 + $0x2] ss:$0 sm:$0xff]  ;;  %v154_v51 = vld [vmem:[%s336_s2 + $0x3] ss:$0 sm:$0xff]  ;;  %s216_s19 = scalar_lea.vmem %s137_s18, 256  ;;  %p221_p3 = scmp.lt.s32.totalorder %s137_s18, %s137_s18 }
  0x29   :  { %v60_v9 = vmul.f32 %v150_v3, %v46_v6  ;;  %v83_v25 = vsub.f32 %v44_v5, %v46_v6  ;;  %p217_p2 = scmp.ne.s32.totalorder %s137_s18, %s216_s19  ;;  %p222_p4 = scmp.lt.s32.totalorder %s216_s19, %s216_s19 }
  0x2a   :  { %v61_v10 = vadd.f32 %v59_v7, %v53_v4 }
  0x2b   :  { %v62_v11 = vadd.f32 %v60_v9, %v54_v8  ;;  %p223_p5 = por %p222_p4, %p221_p3 }
  0x2c   :  { %v64_v12 = vsel %vm63_vm0, %v61_v10, 0.0 }
  0x2d   :  { %65 = vadd.xlane.f32.xlu0 %v64_v12  ;;  %v67_v13 = vsel %vm63_vm0, %v62_v11, 0.0  ;;  %p224_p6 = pnand %p223_p5, %p217_p2 }
  0x31   :  { %68 = vadd.xlane.f32.xlu0 %v67_v13 }
  0xba   :  { %v66_v14 = vpop.xlane.xlu0 %65 }
  0xbb   :  { %v151_v15 = vmul.f32 -1.442695, %v66_v14 }
  0xbd   :  { %160 = vpow2.f32 %v151_v15 }
  0xbe   :  { %v69_v16 = vpop.xlane.xlu0 %68 }
  0xbf   :  { %v152_v17 = vmul.f32 -1.442695, %v69_v16 }
  0xc1   :  { %162 = vpow2.f32 %v152_v17 }
  0xc7   :  { %v161_v18 = vpop.eup %160 }
  0xc8   :  { %v76_v19 = vadd.f32 1.0, %v161_v18 }
  0xca   :  { %164 = vrcp.f32 %v76_v19 }
  0xcb   :  { %v163_v20 = vpop.eup %162 }
  0xcc   :  { %v77_v21 = vadd.f32 1.0, %v163_v20 }
  0xce   :  { %166 = vrcp.f32 %v77_v21 }
  0xd4   :  { %v165_v23 = vpop.eup %164 }
  0xd5   :  { %v84_v24 = vmul.f32 %v165_v23, %v82_v22 }
  0xd7   :  { %v86_v26 = vadd.f32 %v84_v24, %v45_v1 }
  0xd8   :  { %v167_v27 = vpop.eup %166 }
  0xd9   :  { %v88_v28 = vsel %vm63_vm0, %v86_v26, 0.0  ;;  %v85_v29 = vmul.f32 %v167_v27, %v83_v25 }
  0xda   :  { %89 = vadd.xlane.f32.xlu1 %v88_v28 }
  0xdb   :  { %v87_v30 = vadd.f32 %v85_v29, %v46_v6 }
  0xdd   :  { %v91_v31 = vsel %vm63_vm0, %v87_v30, 0.0 }
  0xde   :  { %92 = vadd.xlane.f32.xlu1 %v91_v31 }
 0x167   :  { %v90_v32 = vpop.xlane.xlu1 %89 }
 0x168   :  { %v95_v33 = vmul.f32 0.03125, %v90_v32 }
 0x16a   :  { %v97_v34 = vsub.f32 %v86_v26, %v95_v33 }
 0x16b   :  { %v93_v35 = vpop.xlane.xlu1 %92 }
 0x16c   :  { %v96_v36 = vmul.f32 0.03125, %v93_v35  ;;  %v99_v37 = vmul.f32 %v97_v34, %v97_v34 }
 0x16e   :  { %v98_v38 = vsub.f32 %v87_v30, %v96_v36  ;;  %v101_v39 = vsel %vm63_vm0, %v99_v37, 0.0 }
 0x16f   :  { %102 = vadd.xlane.f32.xlu0 %v101_v39 }
 0x170   :  { %v100_v40 = vmul.f32 %v98_v38, %v98_v38 }
 0x172   :  { %v104_v41 = vsel %vm63_vm0, %v100_v40, 0.0 }
 0x173   :  { %105 = vadd.xlane.f32.xlu1 %v104_v41 }
 0x1fc   :  { %v103_v42 = vpop.xlane.xlu0 %102 }
 0x1fd   :  { %v107_v43 = vmul.f32 0.03125, %v103_v42 }
 0x1ff   :  { %v109_v44 = vadd.f32 1e-05, %v107_v43 }
 0x200   :  { %v106_v45 = vpop.xlane.xlu1 %105 }
 0x201   :  { %168 = vrsqrt.f32 %v109_v44  ;;  %v108_v46 = vmul.f32 0.03125, %v106_v45 }
 0x203   :  { %v110_v47 = vadd.f32 1e-05, %v108_v46 }
 0x205   :  { %170 = vrsqrt.f32 %v110_v47 }
 0x20b   :  { %v169_v48 = vpop.eup %168 }
 0x20c   :  { %v115_v50 = vmul.f32 %v169_v48, %v97_v34 }
 0x20e   :  { %v121_v52 = vmul.f32 %v153_v49, %v115_v50 }
 0x20f   :  { %v171_v53 = vpop.eup %170 }
 0x210   :  { %v116_v54 = vmul.f32 %v171_v53, %v98_v38  ;;  %v127_v55 = vadd.f32 %v154_v51, %v121_v52 }
 0x212   :  { %v122_v56 = vmul.f32 %v153_v49, %v116_v54  ;;  %129 = vst.msk [vmem:[#allocation7] sm:$0xff] %vm63_vm0, %v127_v55 }
 0x214   :  { %v128_v57 = vadd.f32 %v154_v51, %v122_v56 }
 0x216   :  { %130 = vst.msk [vmem:[#allocation7 + $0x8] sm:$0xff] %vm63_vm0, %v128_v57 }
 0x217   :  { %227 = shalt.err (!%p224_p6)
}
 0x218   :  { %s228_s21 = scalar_lea.hbm %s337_s3, 256 }
 0x219   :  { %p229_p7 = scmp.ne.s32.totalorder %s337_s3, %s228_s21  ;;  %p232_p8 = scmp.lt.u32.totalorder %s228_s21, %s337_s3 }
 0x21b   :  { %p234_p9 = pnand %p232_p8, %p229_p7 }
 0x21d   :  { %237 = shalt.err (!%p234_p9)
}
 0x21e   :  { %142 = dma.vmem_to_hbm [thread:$0]  %s137_s18, 256, %s337_s3, [#allocation4], %s245_s22, %s245_s22, %s246_s23  }
 0x21f   :  { %242 = dma.done.wait [#allocation4], 256  }
 0x220   :  { %243 = vsyncadd [#allocation4], 4294967040 }
 0x221   :  { %146 = vsyncpa [#allocation3], 1 }
 0x222   :  { %147 = vsyncpa [#allocation6], 1 }
 0x223   :  { %148 = vsyncpa [#allocation4], 1 }

</bundles_post_ra>
